<compile_context>
chip_gen: v7x
topology: tpu7x:2x2x1
jax: 0.10.0
libtpu: 0.0.40
codegen_flags: <defaults>
</compile_context>

<pallas_src>
import functools

import jax
import jax.numpy as jnp
from jax.experimental import pallas as pl
from jax.experimental.pallas import tpu as pltpu


def _round_up(x, m):
    return ((x + m - 1) // m) * m


def _vmem_limit_bytes():
    """Generation-aware VMEM budget: leave headroom on 64 MiB parts (v7x),
    use more of the 128 MiB parts (v5e/v6e)."""
    cap = 64 * 1024 * 1024                       # conservative default
    try:
        cap = int(pltpu.get_tpu_info().vmem_capacity_bytes)
    except Exception:
        pass
    if cap <= 64 * 1024 * 1024:
        return 48 * 1024 * 1024                  # v7x: headroom for Mosaic scratch
    return 96 * 1024 * 1024                      # v5e / v6e (128 MiB physical)


def _elementwise_bf16_ok():
    """bf16 VALU/EUP exists on v6e/v7x but not on v5e and earlier."""
    try:
        kind = jax.devices()[0].device_kind.lower()
    except Exception:
        return False
    return not any(tag in kind for tag in ("v2", "v3", "v4", "v5"))


# --------------------------------------------------------------------------
# Kernel 1: projection.  Per row block of nodes:
#   Wh = h @ W        (bf16 x bf16 on the MXU, f32 accumulate, stored bf16)
#   f2 = (W a2)^T h^T (f32, emitted directly in row layout [1, tm])
# --------------------------------------------------------------------------
def _proj_kernel(h_ref, w_ref, wa2t_ref, wh_ref, f2r_ref):
    hb = h_ref[...]                                                  # [tm, Fin] f32
    wh_ref[...] = jnp.dot(hb.astype(w_ref.dtype), w_ref[...],
                          preferred_element_type=jnp.float32
                          ).astype(wh_ref.dtype)                     # [tm, Fp] bf16
    f2r_ref[...] = jax.lax.dot_general(
        wa2t_ref[...], hb,
        dimension_numbers=(((1,), (1,)), ((), ())),
        preferred_element_type=jnp.float32)                          # [1, tm] f32


# --------------------------------------------------------------------------
# Kernel 2: masked softmax attention + aggregation, flash-style over columns.
# grid = (row blocks [parallel], column blocks [arbitrary]).
# --------------------------------------------------------------------------
def _attn_kernel(f2r_ref, adj_ref, whcol_ref, whrow_ref, a1_ref, out_ref,
                 f1_sc, m_sc, l_sc, acc_sc, *, alpha, concat, compute_dtype):
    j = pl.program_id(1)
    cdt = compute_dtype

    @pl.when(j == 0)
    def _():
        # f1 = Wh[row block] @ a1 (per-row logit half) + online-softmax init.
        f1_sc[...] = jnp.dot(whrow_ref[...].astype(jnp.float32), a1_ref[...],
                             preferred_element_type=jnp.float32)
        m_sc[...] = jnp.full(m_sc.shape, -jnp.inf, jnp.float32)
        l_sc[...] = jnp.zeros(l_sc.shape, jnp.float32)
        acc_sc[...] = jnp.zeros(acc_sc.shape, jnp.float32)

    # [tm, tk] logits; the elementwise chain runs in `compute_dtype`
    # (bf16 on v6e/v7x: packed vregs + bf16 EUP exp; f32 on v5e).
    logits = f1_sc[...].astype(cdt) + f2r_ref[...].astype(cdt)
    e = jnp.maximum(logits, alpha * logits)                 # LeakyReLU (alpha < 1)
    # Direct int8 compare — no int8->int32 widening (4x fewer vregs / ops).
    att = jnp.where(adj_ref[...] != 0, e, jnp.asarray(-9.0e15, cdt))

    # Online softmax update; running stats / accumulation stay in f32.
    blk_max = jnp.max(att, axis=1, keepdims=True).astype(jnp.float32)
    m_new = jnp.maximum(m_sc[...], blk_max)                 # [tm, 1] f32
    corr = jnp.exp(m_sc[...] - m_new)                       # [tm, 1] f32
    p = jnp.exp(att - m_new.astype(cdt))                    # [tm, tk] EUP exp
    l_sc[...] = corr * l_sc[...] + jnp.sum(p.astype(jnp.float32), axis=1,
                                           keepdims=True)
    acc_sc[...] = corr * acc_sc[...] + jnp.dot(
        p.astype(whcol_ref.dtype), whcol_ref[...],
        preferred_element_type=jnp.float32)                 # [tm, Fp] f32
    m_sc[...] = m_new

    @pl.when(j == pl.num_programs(1) - 1)
    def _():
        h_prime = acc_sc[...] * pl.reciprocal(l_sc[...], approx=True)
        if concat:
            # F.elu (alpha=1).  exp(x)-1 instead of expm1 (expm1 lowering not
            # guaranteed in Mosaic); abs error near 0 is ~1 ulp of 1.0.
            h_prime = jnp.where(h_prime > 0.0, h_prime, jnp.exp(h_prime) - 1.0)
        out_ref[...] = h_prime.astype(out_ref.dtype)


def _gat_forward(h, adj, W, a, *, alpha, concat, block_rows, block_cols,
                 wh_dtype, out_dtype, single_buffer_constants):
    N, in_features = h.shape
    out_features = W.shape[1]

    # TPU-friendly padding: nodes to a multiple of the row tile (itself a
    # multiple of 128), features to a lane-dense multiple of 128.
    tm = min(_round_up(block_rows, 128), _round_up(N, 128))
    Np = _round_up(N, tm)
    Fp = _round_up(out_features, 128)

    h = h.astype(jnp.float32)
    W = W.astype(jnp.float32)
    a = a.astype(jnp.float32)

    h_pad = jnp.pad(h, ((0, Np - N), (0, 0)))
    W_bf16 = jnp.pad(W, ((0, 0), (0, Fp - out_features))).astype(wh_dtype)
    # int8 adjacency: 4x less HBM/VMEM than f32; padded rows/cols = no edge.
    adj_i8 = jnp.pad((adj > 0).astype(jnp.int8), ((0, Np - N), (0, Np - N)))
    a1_pad = jnp.pad(a[:out_features, :], ((0, Fp - out_features), (0, 0)))  # [Fp,1]
    wa2t = (W @ a[out_features:, :]).T                                       # [1,Fin]

    vmem_limit = _vmem_limit_bytes()
    compute_dtype = jnp.bfloat16 if _elementwise_bf16_ok() else jnp.float32
    sbc = bool(single_buffer_constants)

    def const_spec(shape, index_map):
        # Blocks whose index never changes: single-buffer them (double
        # buffering a constant block just duplicates resident VMEM).
        if sbc:
            return pl.BlockSpec(shape, index_map, pipeline_mode=pl.Buffered(1))
        return pl.BlockSpec(shape, index_map)

    cparams1 = pltpu.CompilerParams(
        dimension_semantics=("parallel",), vmem_limit_bytes=vmem_limit)

    # ---- kernel 1: projection (Wh in bf16, f2 row of the attention logit) ---
    wh_p, f2r = pl.pallas_call(
        _proj_kernel,
        grid=(Np // tm,),
        in_specs=(
            pl.BlockSpec((tm, in_features), lambda i: (i, 0)),
            const_spec((in_features, Fp), lambda i: (0, 0)),
            const_spec((1, in_features), lambda i: (0, 0)),
        ),
        out_specs=(
            pl.BlockSpec((tm, Fp), lambda i: (i, 0)),
            pl.BlockSpec((1, tm), lambda i: (0, i)),
        ),
        out_shape=(
            jax.ShapeDtypeStruct((Np, Fp), wh_dtype),
            jax.ShapeDtypeStruct((1, Np), jnp.float32),
        ),
        compiler_params=cparams1,
        cost_estimate=pl.CostEstimate(
            flops=2 * Np * in_features * (Fp + 1),
            transcendentals=0,
            bytes_accessed=(4 * Np * in_features + 2 * in_features * Fp
                            + 4 * in_features + 2 * Np * Fp + 4 * Np)),
    )(h_pad, W_bf16, wa2t)

    # Column tile for the attention kernel: keep Wh resident (tk == Np,
    # single-buffered) while the per-row-block working set fits comfortably in
    # VMEM; otherwise stream flash-style column blocks.
    wh_bytes = jnp.dtype(wh_dtype).itemsize
    resident_bytes = (Np * Fp * wh_bytes          # resident Wh column view
                      + 2 * tm * Np               # adj blocks (int8, x2 buffers)
                      + 8 * tm * Np               # [tm, Np] softmax temporaries
                      + 3 * tm * Fp * 4)          # out block (x2) + f32 accumulator
    if resident_bytes <= vmem_limit // 2:
        tk = Np
    else:
        tk = 128
        for cand in (512, 256, 128):
            if cand <= max(block_cols, 128) and Np % cand == 0:
                tk = cand
                break
    wh_resident = tk == Np

    if wh_resident:
        whcol_spec = const_spec((tk, Fp), lambda i, j: (0, 0))
        f2_spec = const_spec((1, tk), lambda i, j: (0, 0))
    else:
        whcol_spec = pl.BlockSpec((tk, Fp), lambda i, j: (j, 0))
        f2_spec = pl.BlockSpec((1, tk), lambda i, j: (0, j))

    cparams2 = pltpu.CompilerParams(
        dimension_semantics=("parallel", "arbitrary"),
        vmem_limit_bytes=vmem_limit)

    n_row_blocks = Np // tm
    # ---- kernel 2: masked softmax attention + aggregation (the N^2 path) ----
    out_pad = pl.pallas_call(
        functools.partial(_attn_kernel, alpha=float(alpha), concat=bool(concat),
                          compute_dtype=compute_dtype),
        grid=(Np // tm, Np // tk),
        in_specs=(
            f2_spec,                                        # f2 row (column slice)
            pl.BlockSpec((tm, tk), lambda i, j: (i, j)),    # adj block (int8)
            whcol_spec,                                     # Wh column block
            pl.BlockSpec((tm, Fp), lambda i, j: (i, 0)),    # Wh row block (for f1)
            const_spec((Fp, 1), lambda i, j: (0, 0)),       # a1
        ),
        out_specs=pl.BlockSpec((tm, Fp), lambda i, j: (i, 0)),
        out_shape=jax.ShapeDtypeStruct((Np, Fp), out_dtype),
        scratch_shapes=[
            pltpu.VMEM((tm, 1), jnp.float32),   # f1 = Wh[rows] @ a1
            pltpu.VMEM((tm, 1), jnp.float32),   # running max
            pltpu.VMEM((tm, 1), jnp.float32),   # running denominator
            pltpu.VMEM((tm, Fp), jnp.float32),  # output accumulator
        ],
        compiler_params=cparams2,
        cost_estimate=pl.CostEstimate(
            flops=2 * Np * Np * Fp + 10 * Np * Np + 2 * Np * Fp,
            transcendentals=Np * Np + 2 * Np * (Np // tk),
            bytes_accessed=(Np * Np + n_row_blocks * Np * Fp * wh_bytes
                            + Np * Fp * wh_bytes + n_row_blocks * Np * 4
                            + Np * Fp * jnp.dtype(out_dtype).itemsize)),
    )(f2r, adj_i8, wh_p, wh_p, a1_pad)

    return out_pad[:N, :out_features]


def graph_attention_layer(h, adj, W, a, *, alpha=0.2, concat=True,
                          block_rows=128, block_cols=512,
                          wh_dtype=jnp.bfloat16, out_dtype=jnp.float32):
    """Forward pass of the PyTorch GraphAttentionLayer (eval mode)."""
    try:
        return _gat_forward(h, adj, W, a, alpha=alpha, concat=concat,
                            block_rows=block_rows, block_cols=block_cols,
                            wh_dtype=wh_dtype, out_dtype=out_dtype,
                            single_buffer_constants=True)
    except Exception:
        # TODO(synk): drop this fallback once pl.Buffered(1) single-buffering of
        # constant-index blocks is guaranteed on all deployed jaxlib versions.
        return _gat_forward(h, adj, W, a, alpha=alpha, concat=concat,
                            block_rows=block_rows, block_cols=block_cols,
                            wh_dtype=wh_dtype, out_dtype=out_dtype,
                            single_buffer_constants=False)


def _reference(h, adj, W, a, *, alpha, concat):
    """Pure-JAX f32 mirror of the PyTorch forward (eval mode), for validation."""
    Fout = W.shape[1]
    Wh = h @ W
    e = Wh @ a[:Fout, :] + (Wh @ a[Fout:, :]).T
    e = jnp.where(e > 0, e, alpha * e)
    att = jnp.where(adj > 0, e, -9.0e15)
    att = att - jnp.max(att, axis=1, keepdims=True)
    p = jnp.exp(att)
    att = p / jnp.sum(p, axis=1, keepdims=True)
    hp = att @ Wh
    if concat:
        hp = jnp.where(hp > 0, hp, jnp.expm1(hp))
    return hp


def _xavier_uniform(key, shape, gain):
    fan_in, fan_out = shape[0], shape[1]
    bound = gain * (6.0 / (fan_in + fan_out)) ** 0.5
    return jax.random.uniform(key, shape, jnp.float32, -bound, bound)


if __name__ == "__main__":
    # Small, deterministic example consistent with the module's forward.
    N, in_features, out_features = 8, 16, 32
    alpha = 0.2      # LeakyReLU negative slope
    concat = True

    key = jax.random.PRNGKey(0)
    kW, ka, kh, kadj = jax.random.split(key, 4)

    W = _xavier_uniform(kW, (in_features, out_features), gain=1.414)
    a = _xavier_uniform(ka, (2 * out_features, 1), gain=1.414)

    h = jax.random.normal(kh, (N, in_features), jnp.float32)
    adj = (jax.random.uniform(kadj, (N, N)) > 0.5).astype(jnp.float32)
    adj = jnp.maximum(adj, jnp.eye(N, dtype=jnp.float32))  # add self-loops

    out = graph_attention_layer(h, adj, W, a, alpha=alpha, concat=concat)
    out = jax.block_until_ready(out)
    assert out.shape == (N, out_features)
    assert bool(jnp.all(jnp.isfinite(out)))

    ref = _reference(h, adj, W, a, alpha=alpha, concat=concat)
    # bf16 elementwise softmax (v6e/v7x) + bf16 Wh + approx reciprocal -> use a
    # looser absolute tolerance on the bf16 path; tighter on the f32 (v5e) path.
    tol = 1e-1 if _elementwise_bf16_ok() else 5e-2
    max_err = float(jnp.max(jnp.abs(out - ref)))
    assert max_err < tol, f"max abs error vs reference: {max_err}"

    print("KERNEL_OK")
</pallas_src>

<mosaic_0001>
module attributes {stable_mosaic.version = 11 : i64} {
  func.func @_proj_kernel(%arg0: i32, %arg1: memref<128x16xf32, #tpu.memory_space<vmem>>, %arg2: memref<16x128xbf16, #tpu.memory_space<vmem>>, %arg3: memref<1x16xf32, #tpu.memory_space<vmem>>, %arg4: memref<128x128xbf16, #tpu.memory_space<vmem>>, %arg5: memref<1x128xf32, #tpu.memory_space<vmem>>) attributes {dimension_semantics = [#tpu.dimension_semantics<parallel>], iteration_bounds = array<i64: 1>, scalar_prefetch = 0 : i64, scratch_operands = 0 : i64, tpu.core_type = #tpu.core_type<tc>, window_params = [{transform_indices = @transform_0, window_bounds = array<i64: 128, 16>}, {pipeline_mode = #tpu.pipeline_mode<synchronous>, transform_indices = @transform_1, window_bounds = array<i64: 16, 128>}, {pipeline_mode = #tpu.pipeline_mode<synchronous>, transform_indices = @transform_2, window_bounds = array<i64: 1, 16>}, {transform_indices = @transform_3, window_bounds = array<i64: 128, 128>}, {transform_indices = @transform_4, window_bounds = array<i64: 1, 128>}]} {
    %c0 = arith.constant 0 : index
    %c0_0 = arith.constant 0 : index
    %0 = vector.load %arg1[%c0, %c0_0] : memref<128x16xf32, #tpu.memory_space<vmem>>, vector<128x16xf32>
    %1 = arith.truncf %0 : vector<128x16xf32> to vector<128x16xbf16>
    %c0_1 = arith.constant 0 : index
    %c0_2 = arith.constant 0 : index
    %2 = vector.load %arg2[%c0_1, %c0_2] : memref<16x128xbf16, #tpu.memory_space<vmem>>, vector<16x128xbf16>
    %cst = arith.constant dense<0.000000e+00> : vector<128x128xf32>
    %3 = tpu.matmul %1, %2, %cst {dimension_numbers = #tpu.dot_dimension_numbers<[1], [0], [0], [1], [0, 0, 1, 1], [], []>} : vector<128x16xbf16>, vector<16x128xbf16>, vector<128x128xf32> -> vector<128x128xf32>
    %4 = arith.truncf %3 : vector<128x128xf32> to vector<128x128xbf16>
    %c0_3 = arith.constant 0 : index
    %c0_4 = arith.constant 0 : index
    %5 = vector.load %arg4[%c0_3, %c0_4] : memref<128x128xbf16, #tpu.memory_space<vmem>>, vector<128x128xbf16>
    tpu.vector_store %arg4[%c0_3, %c0_4], %4 {strides = array<i32>} : memref<128x128xbf16, #tpu.memory_space<vmem>>, vector<128x128xbf16>,
    %c0_5 = arith.constant 0 : index
    %c0_6 = arith.constant 0 : index
    %6 = vector.load %arg3[%c0_5, %c0_6] : memref<1x16xf32, #tpu.memory_space<vmem>>, vector<1x16xf32>
    %cst_7 = arith.constant dense<0.000000e+00> : vector<1x128xf32>
    %7 = tpu.matmul %6, %0, %cst_7 {dimension_numbers = #tpu.dot_dimension_numbers<[1], [1], [0], [0], [0, 0, 1, 0], [], []>} : vector<1x16xf32>, vector<128x16xf32>, vector<1x128xf32> -> vector<1x128xf32>
    %c0_8 = arith.constant 0 : index
    %c0_9 = arith.constant 0 : index
    %8 = vector.load %arg5[%c0_8, %c0_9] : memref<1x128xf32, #tpu.memory_space<vmem>>, vector<1x128xf32>
    tpu.vector_store %arg5[%c0_8, %c0_9], %7 {strides = array<i32>} : memref<1x128xf32, #tpu.memory_space<vmem>>, vector<1x128xf32>,
    return
  }
  func.func @transform_0(%arg0: i32) -> (i32, i32) {
    %c0_i32 = arith.constant 0 : i32
    %c0_i32_0 = arith.constant 0 : i32
    return %arg0, %c0_i32 : i32, i32
  }
  func.func @transform_1(%arg0: i32) -> (i32, i32) {
    %c0_i32 = arith.constant 0 : i32
    %c0_i32_0 = arith.constant 0 : i32
    %c0_i32_1 = arith.constant 0 : i32
    return %c0_i32, %c0_i32_0 : i32, i32
  }
  func.func @transform_2(%arg0: i32) -> (i32, i32) {
    %c0_i32 = arith.constant 0 : i32
    %c0_i32_0 = arith.constant 0 : i32
    %c0_i32_1 = arith.constant 0 : i32
    return %c0_i32, %c0_i32_0 : i32, i32
  }
  func.func @transform_3(%arg0: i32) -> (i32, i32) {
    %c0_i32 = arith.constant 0 : i32
    %c0_i32_0 = arith.constant 0 : i32
    return %arg0, %c0_i32 : i32, i32
  }
  func.func @transform_4(%arg0: i32) -> (i32, i32) {
    %c0_i32 = arith.constant 0 : i32
    %c0_i32_0 = arith.constant 0 : i32
    return %c0_i32, %arg0 : i32, i32
  }
}

module attributes {stable_mosaic.version = 11 : i64} {
  func.func @_proj_kernel(%arg0: i32, %arg1: memref<128x16xf32, #tpu.memory_space<vmem>>, %arg2: memref<16x128xbf16, #tpu.memory_space<vmem>>, %arg3: memref<1x16xf32, #tpu.memory_space<vmem>>, %arg4: memref<128x128xbf16, #tpu.memory_space<vmem>>, %arg5: memref<1x128xf32, #tpu.memory_space<vmem>>) attributes {dimension_semantics = [#tpu.dimension_semantics<parallel>], iteration_bounds = array<i64: 1>, scalar_prefetch = 0 : i64, scratch_operands = 0 : i64, tpu.core_type = #tpu.core_type<tc>, window_params = [{transform_indices = @transform_0, window_bounds = array<i64: 128, 16>}, {pipeline_mode = #tpu.pipeline_mode<synchronous>, transform_indices = @transform_1, window_bounds = array<i64: 16, 128>}, {pipeline_mode = #tpu.pipeline_mode<synchronous>, transform_indices = @transform_2, window_bounds = array<i64: 1, 16>}, {transform_indices = @transform_3, window_bounds = array<i64: 128, 128>}, {transform_indices = @transform_4, window_bounds = array<i64: 1, 128>}]} {
    %c0 = arith.constant 0 : index
    %c0_0 = arith.constant 0 : index
    %0 = vector.load %arg1[%c0, %c0_0] : memref<128x16xf32, #tpu.memory_space<vmem>>, vector<128x16xf32>
    %1 = arith.truncf %0 : vector<128x16xf32> to vector<128x16xbf16>
    %c0_1 = arith.constant 0 : index
    %c0_2 = arith.constant 0 : index
    %2 = vector.load %arg2[%c0_1, %c0_2] : memref<16x128xbf16, #tpu.memory_space<vmem>>, vector<16x128xbf16>
    %cst = arith.constant dense<0.000000e+00> : vector<128x128xf32>
    %3 = tpu.matmul %1, %2, %cst {dimension_numbers = #tpu.dot_dimension_numbers<[1], [0], [0], [1], [0, 0, 1, 1], [], []>} : vector<128x16xbf16>, vector<16x128xbf16>, vector<128x128xf32> -> vector<128x128xf32>
    %4 = arith.truncf %3 : vector<128x128xf32> to vector<128x128xbf16>
    %c0_3 = arith.constant 0 : index
    %c0_4 = arith.constant 0 : index
    %5 = vector.load %arg4[%c0_3, %c0_4] : memref<128x128xbf16, #tpu.memory_space<vmem>>, vector<128x128xbf16>
    tpu.vector_store %arg4[%c0_3, %c0_4], %4 {strides = array<i32>} : memref<128x128xbf16, #tpu.memory_space<vmem>>, vector<128x128xbf16>,
    %c0_5 = arith.constant 0 : index
    %c0_6 = arith.constant 0 : index
    %6 = vector.load %arg3[%c0_5, %c0_6] : memref<1x16xf32, #tpu.memory_space<vmem>>, vector<1x16xf32>
    %cst_7 = arith.constant dense<0.000000e+00> : vector<1x128xf32>
    %7 = tpu.matmul %6, %0, %cst_7 {dimension_numbers = #tpu.dot_dimension_numbers<[1], [1], [0], [0], [0, 0, 1, 0], [], []>} : vector<1x16xf32>, vector<128x16xf32>, vector<1x128xf32> -> vector<1x128xf32>
    %c0_8 = arith.constant 0 : index
    %c0_9 = arith.constant 0 : index
    %8 = vector.load %arg5[%c0_8, %c0_9] : memref<1x128xf32, #tpu.memory_space<vmem>>, vector<1x128xf32>
    tpu.vector_store %arg5[%c0_8, %c0_9], %7 {strides = array<i32>} : memref<1x128xf32, #tpu.memory_space<vmem>>, vector<1x128xf32>,
    return
  }
  func.func @transform_0(%arg0: i32) -> (i32, i32) {
    %c0_i32 = arith.constant 0 : i32
    %c0_i32_0 = arith.constant 0 : i32
    return %arg0, %c0_i32 : i32, i32
  }
  func.func @transform_1(%arg0: i32) -> (i32, i32) {
    %c0_i32 = arith.constant 0 : i32
    %c0_i32_0 = arith.constant 0 : i32
    %c0_i32_1 = arith.constant 0 : i32
    return %c0_i32, %c0_i32_0 : i32, i32
  }
  func.func @transform_2(%arg0: i32) -> (i32, i32) {
    %c0_i32 = arith.constant 0 : i32
    %c0_i32_0 = arith.constant 0 : i32
    %c0_i32_1 = arith.constant 0 : i32
    return %c0_i32, %c0_i32_0 : i32, i32
  }
  func.func @transform_3(%arg0: i32) -> (i32, i32) {
    %c0_i32 = arith.constant 0 : i32
    %c0_i32_0 = arith.constant 0 : i32
    return %arg0, %c0_i32 : i32, i32
  }
  func.func @transform_4(%arg0: i32) -> (i32, i32) {
    %c0_i32 = arith.constant 0 : i32
    %c0_i32_0 = arith.constant 0 : i32
    return %c0_i32, %arg0 : i32, i32
  }
}

</mosaic_0001>

<bundles_post_ra>
// kernel: tpu_custom_call.1
= control target key start
LH: loop header
LB: loop body
LE: loop exit
PB: predicated region body
PF: predicated region fallthrough
CT: control target
= control target key end

     0   :  { %10 = vsyncpa [#allocation3], 0  ;;  %vm51_vm0 = vcmask 130048   ;;  %v678_v2 = vmov 0.0|0.0   ;;  %vm679_vm2 = vmmov 0   ;;  %v680_v5 = vmov 0.0   ;;  %s819_s0 = inlined_call_operand.vmem [shape: f32[128,16], index: 0, kind: input, shape index: {}]   ;;  %s820_s1 = inlined_call_operand.vmem [shape: bf16[16,128], index: 1, kind: input, shape index: {}]   ;;  %s821_s2 = inlined_call_operand.vmem [shape: f32[1,16], index: 2, kind: input, shape index: {}]   ;;  %s822_s3 = inlined_call_operand.hbm [shape: bf16[128,128], index: 3, kind: output, shape index: {0}]   ;;  %s823_s4 = inlined_call_operand.hbm [shape: f32[1,128], index: 4, kind: output, shape index: {1}]  }
   0x1   :  { %v19_v0 = vld [vmem:[%s819_s0] sm:$0xff]  ;;  %v20_v1 = vld [vmem:[%s819_s0 + $0x8] sm:$0xff]  ;;  %590 = vmatprep.subr.bf16.mxu1 %v678_v2  ;;  %vm718_vm1 = vmpackc.low %vm51_vm0, %vm51_vm0  ;;  %587 = vmatprep.mubr.msk.f32.mxu1 %vm679_vm2, %v680_v5 }
   0x2   :  { %v35_v3 = vpack.c.bf16 %v20_v1, %v19_v0  ;;  %v629_v6 = vld [vmem:[%s820_s1] sm:$0xff]   ;;  %v21_v7 = vld [vmem:[%s819_s0 + $0x10] sm:$0xff]  ;;  %v22_v8 = vld [vmem:[%s819_s0 + $0x18] sm:$0xff] }
   0x3   :  { %v23_v9 = vld [vmem:[%s819_s0 + $0x20] sm:$0xff]  ;;  %v24_v10 = vld [vmem:[%s819_s0 + $0x28] sm:$0xff]  ;;  %537 = vmatprep.subr.bf16.mxu0 %v629_v6  ;;  %v36_v11 = vpack.c.bf16 %v22_v8, %v21_v7 }
   0x4   :  { %593 = vmatpush3.bf16.xpose.msk.msra.mxu1 %vm718_vm1, %v35_v3  ;;  %539 = vmatprep.mubr.msk.bf16.mxu0 %vm51_vm0, %v35_v3 }
   0x5   :  { %594 = vmatprep.subr.bf16.mxu1 %v678_v2  ;;  %538 = vmatpush3.bf16.msra.mxu0 %v629_v6 }
   0x6   :  { %11 = vsyncpa [#allocation5], 0  ;;  %v37_v12 = vpack.c.bf16 %v24_v10, %v23_v9  ;;  %v25_v13 = vld [vmem:[%s819_s0 + $0x30] sm:$0xff]  ;;  %v26_v14 = vld [vmem:[%s819_s0 + $0x38] sm:$0xff] }
   0x7   :  { %v27_v15 = vld [vmem:[%s819_s0 + $0x40] sm:$0xff]  ;;  %v28_v16 = vld [vmem:[%s819_s0 + $0x48] sm:$0xff]  ;;  %v38_v17 = vpack.c.bf16 %v26_v14, %v25_v13  ;;  %v29_v19 = vld [vmem:[%s819_s0 + $0x50] sm:$0xff] }
   0x8   :  { %540 = vmatmul.mubr.msk.bf16.vlgmr.msra.gmra.mrb[0].mxu0 %vm51_vm0, %v36_v11  ;;  %v39_v18 = vpack.c.bf16 %v28_v16, %v27_v15  ;;  %v30_v20 = vld [vmem:[%s819_s0 + $0x58] sm:$0xff]  ;;  %v31_v21 = vld [vmem:[%s819_s0 + $0x60] sm:$0xff]  ;;  %v32_v22 = vld [vmem:[%s819_s0 + $0x68] sm:$0xff] }
   0x9   :  { %543 = vmatprep.mubr.msk.bf16.mxu0 %vm51_vm0, %v37_v12  ;;  %v40_v23 = vpack.c.bf16 %v30_v20, %v29_v19  ;;  %v41_v24 = vpack.c.bf16 %v32_v22, %v31_v21  ;;  %v33_v25 = vld [vmem:[%s819_s0 + $0x70] sm:$0xff]  ;;  %v34_v26 = vld [vmem:[%s819_s0 + $0x78] sm:$0xff]  ;;  %v253_v28 = vld [vmem:[%s821_s2] sm:$0x1]  ;;  %s681_s2 = smov [#allocation2]  }
   0xa   :  { %v42_v27 = vpack.c.bf16 %v34_v26, %v33_v25  ;;  %s381_s23 = sshll.u32 %s681_s2, 4  ;;  %s382_s23 = int_to_ptr.vmem [resolvable:$true] %s381_s23 }
   0xb   :  { %s630_s24 = scalar_lea.vmem %s382_s23, 1024  ;;  %p635_p1 = scmp.lt.s32.totalorder %s382_s23, %s382_s23 }
   0xc   :  { %597 = vmatpush3.bf16.xpose.msk.msra.mxu1 %vm718_vm1, %v36_v11  ;;  %p631_p0 = scmp.ne.s32.totalorder %s382_s23, %s630_s24  ;;  %p636_p2 = scmp.lt.s32.totalorder %s630_s24, %s630_s24 }
   0xd   :  { %598 = vmatprep.subr.bf16.mxu1 %v678_v2 }
   0xe   :  { %p637_p3 = por %p636_p2, %p635_p1 }
  0x10   :  { %544 = vmatmul.mubr.msk.bf16.gmra.mrb[4].mxu0 %vm51_vm0, %v38_v17  ;;  %p638_p4 = pnand %p637_p3, %p631_p0 }
  0x11   :  { %547 = vmatprep.mubr.msk.bf16.mxu0 %vm51_vm0, %v39_v18 }
  0x14   :  { %601 = vmatpush3.bf16.xpose.msk.msra.mxu1 %vm718_vm1, %v37_v12 }
  0x15   :  { %602 = vmatprep.subr.bf16.mxu1 %v678_v2 }
  0x18   :  { %548 = vmatmul.mubr.msk.bf16.gmra.mrb[8].mxu0 %vm51_vm0, %v40_v23 }
  0x19   :  { %551 = vmatprep.mubr.msk.bf16.mxu0 %vm51_vm0, %v41_v24 }
  0x1c   :  { %605 = vmatpush3.bf16.xpose.msk.msra.mxu1 %vm718_vm1, %v38_v17 }
  0x1d   :  { %606 = vmatprep.subr.bf16.mxu1 %v678_v2 }
  0x20   :  { %552 = vmatmul.mubr.msk.bf16.gmra.mrb[12].mxu0 %vm51_vm0, %v42_v27 }
  0x24   :  { %609 = vmatpush3.bf16.xpose.msk.msra.mxu1 %vm718_vm1, %v39_v18 }
  0x25   :  { %610 = vmatprep.subr.bf16.mxu1 %v678_v2 }
  0x2c   :  { %613 = vmatpush3.bf16.xpose.msk.msra.mxu1 %vm718_vm1, %v40_v23 }
  0x2d   :  { %614 = vmatprep.subr.bf16.mxu1 %v678_v2 }
  0x34   :  { %617 = vmatpush3.bf16.xpose.msk.msra.mxu1 %vm718_vm1, %v41_v24 }
  0x35   :  { %618 = vmatprep.subr.bf16.mxu1 %v678_v2 }
  0x3c   :  { %621 = vmatpush3.bf16.xpose.msk.msra.mxu1 %vm718_vm1, %v42_v27 }
  0x43   :  { %588 = vmatmul.mubr.msk.f32.vlgmr.msra.gmra.mrb[0].mxu1 %vm51_vm0, %v253_v28 }
  0xdb   :  { %v541_v29 = vpop.f32.mrb[0].mxu0 }
  0xdc   :  { %v110_v30 = vpop.f32.mrb[1].mxu0 }
  0xdd   :  { %v542_v31 = vpop.f32.mrb[2].mxu0 }
  0xde   :  { %v472_v32 = vpack.c.bf16 %v542_v31, %v541_v29  ;;  %v113_v33 = vpop.f32.mrb[3].mxu0 }
  0xdf   :  { %v467_v34 = vpack.c.bf16 %v113_v33, %v110_v30 }
  0xe0   :  { %504 = vst [vmem:[#allocation2 + $0x8] sm:$0xff] %v472_v32  }
  0xe1   :  { %468 = vst [vmem:[#allocation2] sm:$0xff] %v467_v34  }
  0xe3   :  { %v545_v35 = vpop.f32.mrb[4].mxu0 }
  0xe4   :  { %v126_v36 = vpop.f32.mrb[5].mxu0 }
  0xe5   :  { %v546_v37 = vpop.f32.mrb[6].mxu0 }
  0xe6   :  { %v482_v38 = vpack.c.bf16 %v546_v37, %v545_v35  ;;  %v129_v39 = vpop.f32.mrb[7].mxu0 }
  0xe7   :  { %v477_v40 = vpack.c.bf16 %v129_v39, %v126_v36 }
  0xe8   :  { %506 = vst [vmem:[#allocation2 + $0x18] sm:$0xff] %v482_v38  }
  0xe9   :  { %505 = vst [vmem:[#allocation2 + $0x10] sm:$0xff] %v477_v40  }
  0xeb   :  { %v549_v41 = vpop.f32.mrb[8].mxu0 }
  0xec   :  { %v142_v42 = vpop.f32.mrb[9].mxu0 }
  0xed   :  { %v550_v43 = vpop.f32.mrb[10].mxu0 }
  0xee   :  { %v492_v44 = vpack.c.bf16 %v550_v43, %v549_v41  ;;  %v145_v45 = vpop.f32.mrb[11].mxu0 }
  0xef   :  { %v487_v46 = vpack.c.bf16 %v145_v45, %v142_v42 }
  0xf0   :  { %508 = vst [vmem:[#allocation2 + $0x28] sm:$0xff] %v492_v44  }
  0xf1   :  { %507 = vst [vmem:[#allocation2 + $0x20] sm:$0xff] %v487_v46  }
  0xf3   :  { %v553_v47 = vpop.f32.mrb[12].mxu0 }
  0xf4   :  { %v158_v48 = vpop.f32.mrb[13].mxu0 }
  0xf5   :  { %v554_v49 = vpop.f32.mrb[14].mxu0 }
  0xf6   :  { %v502_v50 = vpack.c.bf16 %v554_v49, %v553_v47  ;;  %v161_v51 = vpop.f32.mrb[15].mxu0 }
  0xf7   :  { %v497_v52 = vpack.c.bf16 %v161_v51, %v158_v48 }
  0xf8   :  { %510 = vst [vmem:[#allocation2 + $0x38] sm:$0xff] %v502_v50  }
  0xf9   :  { %509 = vst [vmem:[#allocation2 + $0x30] sm:$0xff] %v497_v52  }
  0xfa   :  { %641 = shalt.err (!%p638_p4)
}
  0xfb   :  { %s642_s27 = scalar_lea.hbm %s822_s3, 1024 }
  0xfc   :  { %p643_p5 = scmp.ne.s32.totalorder %s822_s3, %s642_s27  ;;  %p646_p6 = scmp.lt.u32.totalorder %s642_s27, %s822_s3 }
  0xfe   :  { %p648_p7 = pnand %p646_p6, %p643_p5 }
 0x100   :  { %651 = shalt.err (!%p648_p7)
}
 0x101   :  { %s682_s5 = smov 64   ;;  %s683_s6 = smov 4  }
 0x102   :  { %387 = dma.vmem_to_hbm [thread:$0]  %s382_s23, 1024, %s822_s3, [#allocation3], %s682_s5, %s682_s5, %s683_s6  }
 0x103   :  { %s684_s9 = smov [#allocation4]  }
 0x104   :  { %s394_s10 = sshll.u32 %s684_s9, 4  ;;  %s395_s10 = int_to_ptr.vmem [resolvable:$true] %s394_s10 }
 0x105   :  { %s652_s11 = scalar_lea.vmem %s395_s10, 16  ;;  %s656_s12 = scalar_lea.vmem %s395_s10, 32 }
 0x106   :  { %p653_p8 = scmp.ne.s32.totalorder %s395_s10, %s652_s11  ;;  %p657_p9 = scmp.lt.s32.totalorder %s395_s10, %s395_s10 }
 0x107   :  { %p658_p10 = scmp.lt.s32.totalorder %s656_s12, %s652_s11 }
 0x109   :  { %p659_p11 = por %p658_p10, %p657_p9 }
 0x10b   :  { %p660_p12 = pnand %p659_p11, %p653_p8 }
 0x116   :  { %v371_v53 = vpop.f32.mrb[0].mxu1 }
 0x117   :  { %375 = vst [vmem:[#allocation4] sm:$0x1] %v371_v53  ;;  %v589_v54 = vpop.f32.mrb[1].mxu1 }
 0x118   :  { %663 = shalt.err (!%p660_p12)
}
 0x119   :  { %s664_s15 = scalar_lea.hbm %s823_s4, 16 }
 0x11a   :  { %p665_p13 = scmp.ne.s32.totalorder %s823_s4, %s664_s15  ;;  %p668_p0 = scmp.lt.u32.totalorder %s664_s15, %s823_s4 }
 0x11c   :  { %p670_p1 = pnand %p668_p0, %p665_p13 }
 0x11e   :  { %673 = shalt.err (!%p670_p1)
}
 0x11f   :  { %397 = dma.vmem_to_hbm [thread:$0]  %s395_s10, 16, %s823_s4, [#allocation5]  }
 0x120   :  { %674 = dma.done.wait [#allocation3], 1024  }
 0x121   :  { %675 = vsyncadd [#allocation3], 4294966272 }
 0x122   :  { %676 = dma.done.wait [#allocation5], 16  }
 0x123   :  { %677 = vsyncadd [#allocation5], 4294967280 }
 0x124   :  { %404 = vsyncpa [#allocation3], 1 }
 0x125   :  { %405 = vsyncpa [#allocation5], 1 }

// kernel: tpu_custom_call.1
= control target key start
LH: loop header
LB: loop body
LE: loop exit
PB: predicated region body
PF: predicated region fallthrough
CT: control target
= control target key end

     0   :  { %10 = vsyncpa [#allocation3], 0  ;;  %vm51_vm0 = vcmask 130048   ;;  %v678_v2 = vmov 0.0|0.0   ;;  %vm679_vm2 = vmmov 0   ;;  %v680_v5 = vmov 0.0   ;;  %s819_s0 = inlined_call_operand.vmem [shape: f32[128,16], index: 0, kind: input, shape index: {}]   ;;  %s820_s1 = inlined_call_operand.vmem [shape: bf16[16,128], index: 1, kind: input, shape index: {}]   ;;  %s821_s2 = inlined_call_operand.vmem [shape: f32[1,16], index: 2, kind: input, shape index: {}]   ;;  %s822_s3 = inlined_call_operand.hbm [shape: bf16[128,128], index: 3, kind: output, shape index: {0}]   ;;  %s823_s4 = inlined_call_operand.hbm [shape: f32[1,128], index: 4, kind: output, shape index: {1}]  }
   0x1   :  { %v19_v0 = vld [vmem:[%s819_s0] sm:$0xff]  ;;  %v20_v1 = vld [vmem:[%s819_s0 + $0x8] sm:$0xff]  ;;  %590 = vmatprep.subr.bf16.mxu1 %v678_v2  ;;  %vm718_vm1 = vmpackc.low %vm51_vm0, %vm51_vm0  ;;  %587 = vmatprep.mubr.msk.f32.mxu1 %vm679_vm2, %v680_v5 }
   0x2   :  { %v35_v3 = vpack.c.bf16 %v20_v1, %v19_v0  ;;  %v629_v6 = vld [vmem:[%s820_s1] sm:$0xff]   ;;  %v21_v7 = vld [vmem:[%s819_s0 + $0x10] sm:$0xff]  ;;  %v22_v8 = vld [vmem:[%s819_s0 + $0x18] sm:$0xff] }
   0x3   :  { %v23_v9 = vld [vmem:[%s819_s0 + $0x20] sm:$0xff]  ;;  %v24_v10 = vld [vmem:[%s819_s0 + $0x28] sm:$0xff]  ;;  %537 = vmatprep.subr.bf16.mxu0 %v629_v6  ;;  %v36_v11 = vpack.c.bf16 %v22_v8, %v21_v7 }
   0x4   :  { %593 = vmatpush3.bf16.xpose.msk.msra.mxu1 %vm718_vm1, %v35_v3  ;;  %539 = vmatprep.mubr.msk.bf16.mxu0 %vm51_vm0, %v35_v3 }
   0x5   :  { %594 = vmatprep.subr.bf16.mxu1 %v678_v2  ;;  %538 = vmatpush3.bf16.msra.mxu0 %v629_v6 }
   0x6   :  { %11 = vsyncpa [#allocation5], 0  ;;  %v37_v12 = vpack.c.bf16 %v24_v10, %v23_v9  ;;  %v25_v13 = vld [vmem:[%s819_s0 + $0x30] sm:$0xff]  ;;  %v26_v14 = vld [vmem:[%s819_s0 + $0x38] sm:$0xff] }
   0x7   :  { %v27_v15 = vld [vmem:[%s819_s0 + $0x40] sm:$0xff]  ;;  %v28_v16 = vld [vmem:[%s819_s0 + $0x48] sm:$0xff]  ;;  %v38_v17 = vpack.c.bf16 %v26_v14, %v25_v13  ;;  %v29_v19 = vld [vmem:[%s819_s0 + $0x50] sm:$0xff] }
   0x8   :  { %540 = vmatmul.mubr.msk.bf16.vlgmr.msra.gmra.mrb[0].mxu0 %vm51_vm0, %v36_v11  ;;  %v39_v18 = vpack.c.bf16 %v28_v16, %v27_v15  ;;  %v30_v20 = vld [vmem:[%s819_s0 + $0x58] sm:$0xff]  ;;  %v31_v21 = vld [vmem:[%s819_s0 + $0x60] sm:$0xff]  ;;  %v32_v22 = vld [vmem:[%s819_s0 + $0x68] sm:$0xff] }
   0x9   :  { %543 = vmatprep.mubr.msk.bf16.mxu0 %vm51_vm0, %v37_v12  ;;  %v40_v23 = vpack.c.bf16 %v30_v20, %v29_v19  ;;  %v41_v24 = vpack.c.bf16 %v32_v22, %v31_v21  ;;  %v33_v25 = vld [vmem:[%s819_s0 + $0x70] sm:$0xff]  ;;  %v34_v26 = vld [vmem:[%s819_s0 + $0x78] sm:$0xff]  ;;  %v253_v28 = vld [vmem:[%s821_s2] sm:$0x1]  ;;  %s681_s2 = smov [#allocation2]  }
   0xa   :  { %v42_v27 = vpack.c.bf16 %v34_v26, %v33_v25  ;;  %s381_s23 = sshll.u32 %s681_s2, 4  ;;  %s382_s23 = int_to_ptr.vmem [resolvable:$true] %s381_s23 }
   0xb   :  { %s630_s24 = scalar_lea.vmem %s382_s23, 1024  ;;  %p635_p1 = scmp.lt.s32.totalorder %s382_s23, %s382_s23 }
   0xc   :  { %597 = vmatpush3.bf16.xpose.msk.msra.mxu1 %vm718_vm1, %v36_v11  ;;  %p631_p0 = scmp.ne.s32.totalorder %s382_s23, %s630_s24  ;;  %p636_p2 = scmp.lt.s32.totalorder %s630_s24, %s630_s24 }
   0xd   :  { %598 = vmatprep.subr.bf16.mxu1 %v678_v2 }
   0xe   :  { %p637_p3 = por %p636_p2, %p635_p1 }
  0x10   :  { %544 = vmatmul.mubr.msk.bf16.gmra.mrb[4].mxu0 %vm51_vm0, %v38_v17  ;;  %p638_p4 = pnand %p637_p3, %p631_p0 }
  0x11   :  { %547 = vmatprep.mubr.msk.bf16.mxu0 %vm51_vm0, %v39_v18 }
  0x14   :  { %601 = vmatpush3.bf16.xpose.msk.msra.mxu1 %vm718_vm1, %v37_v12 }
  0x15   :  { %602 = vmatprep.subr.bf16.mxu1 %v678_v2 }
  0x18   :  { %548 = vmatmul.mubr.msk.bf16.gmra.mrb[8].mxu0 %vm51_vm0, %v40_v23 }
  0x19   :  { %551 = vmatprep.mubr.msk.bf16.mxu0 %vm51_vm0, %v41_v24 }
  0x1c   :  { %605 = vmatpush3.bf16.xpose.msk.msra.mxu1 %vm718_vm1, %v38_v17 }
  0x1d   :  { %606 = vmatprep.subr.bf16.mxu1 %v678_v2 }
  0x20   :  { %552 = vmatmul.mubr.msk.bf16.gmra.mrb[12].mxu0 %vm51_vm0, %v42_v27 }
  0x24   :  { %609 = vmatpush3.bf16.xpose.msk.msra.mxu1 %vm718_vm1, %v39_v18 }
  0x25   :  { %610 = vmatprep.subr.bf16.mxu1 %v678_v2 }
  0x2c   :  { %613 = vmatpush3.bf16.xpose.msk.msra.mxu1 %vm718_vm1, %v40_v23 }
  0x2d   :  { %614 = vmatprep.subr.bf16.mxu1 %v678_v2 }
  0x34   :  { %617 = vmatpush3.bf16.xpose.msk.msra.mxu1 %vm718_vm1, %v41_v24 }
  0x35   :  { %618 = vmatprep.subr.bf16.mxu1 %v678_v2 }
  0x3c   :  { %621 = vmatpush3.bf16.xpose.msk.msra.mxu1 %vm718_vm1, %v42_v27 }
  0x43   :  { %588 = vmatmul.mubr.msk.f32.vlgmr.msra.gmra.mrb[0].mxu1 %vm51_vm0, %v253_v28 }
  0xdb   :  { %v541_v29 = vpop.f32.mrb[0].mxu0 }
  0xdc   :  { %v110_v30 = vpop.f32.mrb[1].mxu0 }
  0xdd   :  { %v542_v31 = vpop.f32.mrb[2].mxu0 }
  0xde   :  { %v472_v32 = vpack.c.bf16 %v542_v31, %v541_v29  ;;  %v113_v33 = vpop.f32.mrb[3].mxu0 }
  0xdf   :  { %v467_v34 = vpack.c.bf16 %v113_v33, %v110_v30 }
  0xe0   :  { %504 = vst [vmem:[#allocation2 + $0x8] sm:$0xff] %v472_v32  }
  0xe1   :  { %468 = vst [vmem:[#allocation2] sm:$0xff] %v467_v34  }
  0xe3   :  { %v545_v35 = vpop.f32.mrb[4].mxu0 }
  0xe4   :  { %v126_v36 = vpop.f32.mrb[5].mxu0 }
  0xe5   :  { %v546_v37 = vpop.f32.mrb[6].mxu0 }
  0xe6   :  { %v482_v38 = vpack.c.bf16 %v546_v37, %v545_v35  ;;  %v129_v39 = vpop.f32.mrb[7].mxu0 }
  0xe7   :  { %v477_v40 = vpack.c.bf16 %v129_v39, %v126_v36 }
  0xe8   :  { %506 = vst [vmem:[#allocation2 + $0x18] sm:$0xff] %v482_v38  }
  0xe9   :  { %505 = vst [vmem:[#allocation2 + $0x10] sm:$0xff] %v477_v40  }
  0xeb   :  { %v549_v41 = vpop.f32.mrb[8].mxu0 }
  0xec   :  { %v142_v42 = vpop.f32.mrb[9].mxu0 }
  0xed   :  { %v550_v43 = vpop.f32.mrb[10].mxu0 }
  0xee   :  { %v492_v44 = vpack.c.bf16 %v550_v43, %v549_v41  ;;  %v145_v45 = vpop.f32.mrb[11].mxu0 }
  0xef   :  { %v487_v46 = vpack.c.bf16 %v145_v45, %v142_v42 }
  0xf0   :  { %508 = vst [vmem:[#allocation2 + $0x28] sm:$0xff] %v492_v44  }
  0xf1   :  { %507 = vst [vmem:[#allocation2 + $0x20] sm:$0xff] %v487_v46  }
  0xf3   :  { %v553_v47 = vpop.f32.mrb[12].mxu0 }
  0xf4   :  { %v158_v48 = vpop.f32.mrb[13].mxu0 }
  0xf5   :  { %v554_v49 = vpop.f32.mrb[14].mxu0 }
  0xf6   :  { %v502_v50 = vpack.c.bf16 %v554_v49, %v553_v47  ;;  %v161_v51 = vpop.f32.mrb[15].mxu0 }
  0xf7   :  { %v497_v52 = vpack.c.bf16 %v161_v51, %v158_v48 }
  0xf8   :  { %510 = vst [vmem:[#allocation2 + $0x38] sm:$0xff] %v502_v50  }
  0xf9   :  { %509 = vst [vmem:[#allocation2 + $0x30] sm:$0xff] %v497_v52  }
  0xfa   :  { %641 = shalt.err (!%p638_p4)
}
  0xfb   :  { %s642_s27 = scalar_lea.hbm %s822_s3, 1024 }
  0xfc   :  { %p643_p5 = scmp.ne.s32.totalorder %s822_s3, %s642_s27  ;;  %p646_p6 = scmp.lt.u32.totalorder %s642_s27, %s822_s3 }
  0xfe   :  { %p648_p7 = pnand %p646_p6, %p643_p5 }
 0x100   :  { %651 = shalt.err (!%p648_p7)
}
 0x101   :  { %s682_s5 = smov 64   ;;  %s683_s6 = smov 4  }
 0x102   :  { %387 = dma.vmem_to_hbm [thread:$0]  %s382_s23, 1024, %s822_s3, [#allocation3], %s682_s5, %s682_s5, %s683_s6  }
 0x103   :  { %s684_s9 = smov [#allocation4]  }
 0x104   :  { %s394_s10 = sshll.u32 %s684_s9, 4  ;;  %s395_s10 = int_to_ptr.vmem [resolvable:$true] %s394_s10 }
 0x105   :  { %s652_s11 = scalar_lea.vmem %s395_s10, 16  ;;  %s656_s12 = scalar_lea.vmem %s395_s10, 32 }
 0x106   :  { %p653_p8 = scmp.ne.s32.totalorder %s395_s10, %s652_s11  ;;  %p657_p9 = scmp.lt.s32.totalorder %s395_s10, %s395_s10 }
 0x107   :  { %p658_p10 = scmp.lt.s32.totalorder %s656_s12, %s652_s11 }
 0x109   :  { %p659_p11 = por %p658_p10, %p657_p9 }
 0x10b   :  { %p660_p12 = pnand %p659_p11, %p653_p8 }
 0x116   :  { %v371_v53 = vpop.f32.mrb[0].mxu1 }
 0x117   :  { %375 = vst [vmem:[#allocation4] sm:$0x1] %v371_v53  ;;  %v589_v54 = vpop.f32.mrb[1].mxu1 }
 0x118   :  { %663 = shalt.err (!%p660_p12)
}
 0x119   :  { %s664_s15 = scalar_lea.hbm %s823_s4, 16 }
 0x11a   :  { %p665_p13 = scmp.ne.s32.totalorder %s823_s4, %s664_s15  ;;  %p668_p0 = scmp.lt.u32.totalorder %s664_s15, %s823_s4 }
 0x11c   :  { %p670_p1 = pnand %p668_p0, %p665_p13 }
 0x11e   :  { %673 = shalt.err (!%p670_p1)
}
 0x11f   :  { %397 = dma.vmem_to_hbm [thread:$0]  %s395_s10, 16, %s823_s4, [#allocation5]  }
 0x120   :  { %674 = dma.done.wait [#allocation3], 1024  }
 0x121   :  { %675 = vsyncadd [#allocation3], 4294966272 }
 0x122   :  { %676 = dma.done.wait [#allocation5], 16  }
 0x123   :  { %677 = vsyncadd [#allocation5], 4294967280 }
 0x124   :  { %404 = vsyncpa [#allocation3], 1 }
 0x125   :  { %405 = vsyncpa [#allocation5], 1 }

</bundles_post_ra>
